<compile_context>
chip_gen: v5e
topology: v5e:2x2
jax: 0.10.0
libtpu: 0.0.40
codegen_flags: <defaults>
</compile_context>

<pallas_src>
import jax
import jax.numpy as jnp
from jax.experimental import pallas as pl
from jax.experimental.pallas import tpu as pltpu

LANE_WIDTH = 512        # lane (last-dim) width of the 2D slab; multiple of 128
MAX_BLOCK_ROWS = 1024   # (1024, 512) f32 = 2 MiB / buffer; ~8 MiB VMEM total


def rotation_matrix_from_angle(theta):
    # Mirrors the PyTorch reference, including its early `return` inside the
    # loop: only theta[0] is ever used, producing a (1, 2, 2) tensor.
    c = jnp.cos(theta[0])[0]
    s = jnp.sin(theta[0])[0]
    rot = jnp.stack([jnp.stack([c, -s]), jnp.stack([s, c])])  # (2, 2)
    return rot[None]                                          # (1, 2, 2)


def _rot_kernel(w_ref, x_ref, o_ref):
    # w_ref: SMEM (4,) f32 = [w00, w01, w10, w11]
    # x_ref/o_ref: VMEM (R_blk, 512) blocks of the interleaved [x, y, x, y, ...]
    # flattened point stream.  For a pair (x, y):
    #   out_even = x*w00 + y*w10
    #   out_odd  = y*w11 + x*w01
    w00 = w_ref[0]
    w01 = w_ref[1]
    w10 = w_ref[2]
    w11 = w_ref[3]

    v = x_ref[...].astype(jnp.float32)
    n_lanes = v.shape[1]

    lane = jax.lax.broadcasted_iota(jnp.int32, v.shape, 1)
    even = (lane & 1) == 0

    # Pair swap (swapped[i] = v[i ^ 1]) on the otherwise-idle XLU.
    # pltpu.roll follows jnp.roll semantics: roll(v, s)[i] = v[(i - s) % n].
    fwd = pltpu.roll(v, n_lanes - 1, axis=1)   # fwd[i] = v[i + 1]
    bwd = pltpu.roll(v, 1, axis=1)             # bwd[i] = v[i - 1]
    swapped = jnp.where(even, fwd, bwd)

    diag = jnp.where(even, w00, w11)           # multiplies the own coordinate
    off = jnp.where(even, w10, w01)            # multiplies the partner coord

    o_ref[...] = (v * diag + swapped * off).astype(o_ref.dtype)


def _ceil_div(a, b):
    return -(-a // b)


def _pick_tiling(rows):
    """Pick (block_rows, grid_size) for a (rows, LANE_WIDTH) slab."""
    if rows <= MAX_BLOCK_ROWS:
        # Single block equal to the full array extent (always a legal block
        # shape, even when rows is not a multiple of 8).
        return rows, 1
    r_blk = MAX_BLOCK_ROWS
    grid = _ceil_div(rows, r_blk)
    if grid % 2:
        # Make the grid even so a dual-TensorCore chip (v7x) splits the
        # "parallel" axis evenly; costs at most one extra ~0.35 us step on
        # single-core generations, negligible at these sizes.
        grid += 1
        r_blk = _ceil_div(_ceil_div(rows, grid), 8) * 8
        grid = _ceil_div(rows, r_blk)
    return r_blk, grid


def nonrigid_transform_init_forward(x, weights, num_frames):
    """x: reshapeable to (B, num_frames, 8, 2); weights: (1, 2, 2).

    Returns (B, num_frames * 8, 1, 2), matching the PyTorch forward.
    """
    B = x.shape[0]
    n_vec = B * num_frames * 8           # number of 2-vectors
    total = n_vec * 2                    # total scalar elements

    # torch slices weights[0:num_frames*8] but only one (2,2) entry exists; it
    # broadcasts over all batch dims in the matmul.
    w_flat = weights[0].reshape(4).astype(jnp.float32)   # [w00, w01, w10, w11]

    # Natural interleaved layout (no transpose): pairs stay lane-adjacent.
    flat = x.reshape(total)

    pad = (-total) % LANE_WIDTH
    if pad:
        # Only for lane-unaligned totals (rare / tiny inputs).  The aligned
        # path below is copy-free: all reshapes are pure bitcasts.
        flat = jnp.pad(flat, (0, pad))
    rows = (total + pad) // LANE_WIDTH

    r_blk, grid_n = _pick_tiling(rows)

    itemsize = jnp.dtype(x.dtype).itemsize
    out2d = pl.pallas_call(
        _rot_kernel,
        out_shape=jax.ShapeDtypeStruct((rows, LANE_WIDTH), x.dtype),
        grid_spec=pltpu.PrefetchScalarGridSpec(
            num_scalar_prefetch=0,
            grid=(grid_n,),
            in_specs=[
                pl.BlockSpec(memory_space=pltpu.SMEM),                # (4,) weights
                pl.BlockSpec((r_blk, LANE_WIDTH), lambda i: (i, 0)),  # x slab tile
            ],
            out_specs=pl.BlockSpec((r_blk, LANE_WIDTH), lambda i: (i, 0)),
        ),
        compiler_params=pltpu.CompilerParams(
            dimension_semantics=("parallel",)),
        cost_estimate=pl.CostEstimate(
            flops=6 * n_vec,
            transcendentals=0,
            bytes_accessed=2 * total * itemsize),
    )(w_flat, flat.reshape(rows, LANE_WIDTH))

    out_flat = out2d.reshape(rows * LANE_WIDTH)
    if pad:
        out_flat = out_flat[:total]
    return out_flat.reshape(B, num_frames * 8, 1, 2)


if __name__ == "__main__":
    num_joints = 4
    key = jax.random.PRNGKey(0)
    k_w1, k_w2, k_w3, k_x1, k_x2, k_x3 = jax.random.split(key, 6)

    def make_weights(num_frames, k):
        # __init__: angles (num_frames*num_joints, 1) ~ U(-0.3, 0.3) -> (1,2,2)
        angles = jax.random.uniform(
            k, (num_frames * num_joints, 1), minval=-0.3, maxval=0.3,
            dtype=jnp.float32)
        return rotation_matrix_from_angle(angles)

    def reference(x, weights, num_frames):
        B = x.shape[0]
        x_ = x.reshape(B, num_frames * 8, 1, 2)
        return jnp.matmul(x_, weights[0])

    def check(B, num_frames, k_w, k_x):
        weights = make_weights(num_frames, k_w)
        x = jax.random.normal(k_x, (B, num_frames, 8, 2), dtype=jnp.float32)
        out = jax.block_until_ready(
            nonrigid_transform_init_forward(x, weights, num_frames))
        ref = reference(x, weights, num_frames)
        assert out.shape == (B, num_frames * 8, 1, 2)
        assert jnp.allclose(out, ref, atol=1e-5, rtol=1e-5), (
            f"mismatch vs reference at B={B}, num_frames={num_frames}")

    # 1) Lane-aligned small case: total = 1024 -> no pad, single (2, 512) block.
    check(B=2, num_frames=32, k_w=k_w1, k_x=k_x1)

    # 2) Tiny lane-unaligned case: total = 256 -> exercises the pad fallback.
    check(B=2, num_frames=8, k_w=k_w2, k_x=k_x2)

    # 3) Multi-block case: rows = 2050 -> even grid of 4 with a masked edge block.
    check(B=2, num_frames=32800, k_w=k_w3, k_x=k_x3)

    print("KERNEL_OK")
</pallas_src>

<mosaic_0001>
module attributes {stable_mosaic.version = 11 : i64} {
  func.func @_rot_kernel(%arg0: i32, %arg1: memref<4xf32, #tpu.memory_space<smem>>, %arg2: memref<2x512xf32, #tpu.memory_space<vmem>>, %arg3: memref<2x512xf32, #tpu.memory_space<vmem>>) attributes {dimension_semantics = [#tpu.dimension_semantics<parallel>], iteration_bounds = array<i64: 1>, scalar_prefetch = 0 : i64, scratch_operands = 0 : i64, tpu.core_type = #tpu.core_type<tc>, window_params = [{transform_indices = @transform_0, window_bounds = array<i64: 4>}, {transform_indices = @transform_1, window_bounds = array<i64: 2, 512>}, {transform_indices = @transform_2, window_bounds = array<i64: 2, 512>}]} {
    %c0 = arith.constant 0 : index
    %0 = memref.load %arg1[%c0] : memref<4xf32, #tpu.memory_space<smem>>
    %c1 = arith.constant 1 : index
    %1 = memref.load %arg1[%c1] : memref<4xf32, #tpu.memory_space<smem>>
    %c2 = arith.constant 2 : index
    %2 = memref.load %arg1[%c2] : memref<4xf32, #tpu.memory_space<smem>>
    %c3 = arith.constant 3 : index
    %3 = memref.load %arg1[%c3] : memref<4xf32, #tpu.memory_space<smem>>
    %c0_0 = arith.constant 0 : index
    %c0_1 = arith.constant 0 : index
    %4 = vector.load %arg2[%c0_0, %c0_1] : memref<2x512xf32, #tpu.memory_space<vmem>>, vector<2x512xf32>
    %5 = tpu.iota {dimensions = array<i32: 1>} : vector<2x512xi32>
    %c1_i32 = arith.constant 1 : i32
    %6 = vector.broadcast %c1_i32 : i32 to vector<2x512xi32>
    %7 = arith.andi %5, %6 : vector<2x512xi32>
    %c0_i32 = arith.constant 0 : i32
    %8 = vector.broadcast %c0_i32 : i32 to vector<2x512xi32>
    %9 = arith.cmpi eq, %7, %8 : vector<2x512xi32>
    %c511_i32 = arith.constant 511 : i32
    %10 = tpu.dynamic_rotate %4 by %c511_i32 dim 1 : vector<2x512xf32>, i32 -> vector<2x512xf32>
    %c1_i32_2 = arith.constant 1 : i32
    %11 = tpu.dynamic_rotate %4 by %c1_i32_2 dim 1 : vector<2x512xf32>, i32 -> vector<2x512xf32>
    %12 = arith.select %9, %10, %11 : vector<2x512xi1>, vector<2x512xf32>
    %13 = vector.broadcast %0 : f32 to vector<2x512xf32>
    %14 = vector.broadcast %3 : f32 to vector<2x512xf32>
    %15 = arith.select %9, %13, %14 : vector<2x512xi1>, vector<2x512xf32>
    %16 = vector.broadcast %2 : f32 to vector<2x512xf32>
    %17 = vector.broadcast %1 : f32 to vector<2x512xf32>
    %18 = arith.select %9, %16, %17 : vector<2x512xi1>, vector<2x512xf32>
    %19 = arith.mulf %4, %15 : vector<2x512xf32>
    %20 = arith.mulf %12, %18 : vector<2x512xf32>
    %21 = arith.addf %19, %20 : vector<2x512xf32>
    %c0_3 = arith.constant 0 : index
    %c0_4 = arith.constant 0 : index
    %22 = vector.load %arg3[%c0_3, %c0_4] : memref<2x512xf32, #tpu.memory_space<vmem>>, vector<2x512xf32>
    tpu.vector_store %arg3[%c0_3, %c0_4], %21 {strides = array<i32>} : memref<2x512xf32, #tpu.memory_space<vmem>>, vector<2x512xf32>,
    return
  }
  func.func @transform_0(%arg0: i32) -> i32 {
    %c0_i32 = arith.constant 0 : i32
    %c0_i32_0 = arith.constant 0 : i32
    return %c0_i32 : i32
  }
  func.func @transform_1(%arg0: i32) -> (i32, i32) {
    %c0_i32 = arith.constant 0 : i32
    %c0_i32_0 = arith.constant 0 : i32
    return %arg0, %c0_i32 : i32, i32
  }
  func.func @transform_2(%arg0: i32) -> (i32, i32) {
    %c0_i32 = arith.constant 0 : i32
    %c0_i32_0 = arith.constant 0 : i32
    return %arg0, %c0_i32 : i32, i32
  }
}

</mosaic_0001>

<bundles_post_ra>
// kernel: tpu_custom_call.1
= control target key start
LH: loop header
LB: loop body
LE: loop exit
PB: predicated region body
PF: predicated region fallthrough
CT: control target
= control target key end

     0   :  { %7 = vsyncpa [#allocation5], 0  ;;  %s330_s0 = inlined_call_operand.hbm [shape: f32[4], index: 0, kind: input, shape index: {}]   ;;  %s331_s1 = inlined_call_operand.hbm [shape: f32[2,512], index: 1, kind: input, shape index: {}]   ;;  %s332_s2 = inlined_call_operand.hbm [shape: f32[2,512], index: 2, kind: output, shape index: {}]  }
   0x1   :  { %8 = vsyncpa [#allocation3], 0 }
   0x2   :  { %9 = vsyncpa [#allocation4], 0  ;;  %s15_s11 = sshll.u32 %s330_s0, 4  ;;  %s24_s14 = sshll.u32 %s331_s1, 4  ;;  %s16_s11 = int_to_ptr.hbm [resolvable:$true] %s15_s11  ;;  %s25_s14 = int_to_ptr.hbm [resolvable:$true] %s24_s14 }
   0x3   :  { %s242_s15 = smov [#allocation2]   ;;  %s243_s16 = smov [#allocation6]  }
   0x4   :  { %18 = dma.hbm_to_smem %s16_s11, 16, %s242_s15, [#allocation5]  }
   0x5   :  { %s26_s17 = sshll.u32 %s243_s16, 4  ;;  %s27_s17 = int_to_ptr.vmem [resolvable:$true] %s26_s17 }
   0x6   :  { %29 = dma.hbm_to_vmem [thread:$0]  %s25_s14, 128, %s27_s17, [#allocation3]  }
   0x7   :  { %236 = dma.done.wait [#allocation5], 16  }
   0x8   :  { %237 = vsyncadd [#allocation5], 4294967280 }
   0x9   :  { %238 = dma.done.wait [#allocation3], 128  }
   0xa   :  { %239 = vsyncadd [#allocation3], 4294967168 }
   0xb   :  { %38 = sfence }
   0xc   :  { %v268_v0 = vld [vmem:[#allocation6] sm:$0xff]  ;;  %s244_s0 = smov 127   ;;  %s245_s1 = smov 1   ;;  %v44_v9 = vlaneseq  ;;  %vm125_vm6 = vcmask 1041408   ;;  %vm127_vm7 = vcmask 1045508   ;;  %vm129_vm8 = vcmask 1043456  }
   0xd   :  { %58 = vst [vmem:[#allocation1] ss:$4 sm:$0xff] %v268_v0  ;;  %s39_s18 = sld [smem:[#allocation2]]  ;;  %s246_s22 = smov [#allocation7]  }
   0xe   :  { %v45_v10 = vand.u32 127, %v44_v9  ;;  %s170_s19 = sld [smem:[#allocation2 + $0x3]]  ;;  %s155_s23 = sshll.u32 %s246_s22, 4  ;;  %s156_s23 = int_to_ptr.vmem [resolvable:$true] %s155_s23 }
   0xf   :  { %s168_s20 = sld [smem:[#allocation2 + $0x1]]  ;;  %s157_s26 = sshll.u32 %s332_s2, 4  ;;  %s158_s26 = int_to_ptr.hbm [resolvable:$true] %s157_s26 }
  0x10   :  { %v47_v12 = vadd.s32 256, %v45_v10  ;;  %v48_v13 = vadd.s32 384, %v45_v10  ;;  %v46_v14 = vadd.s32 128, %v45_v10  ;;  %s169_s21 = sld [smem:[#allocation2 + $0x2]]  ;;  %v49_v25 = vand.u32 1, %v45_v10 }
  0x11   :  { %vm75_vm3 = vcmp.lt.s32.totalorder %v45_v10, 127  ;;  %vm97_vm4 = vcmp.lt.s32.totalorder %v45_v10, 1 }
  0x12   :  { %v51_v17 = vand.u32 1, %v47_v12  ;;  %v52_v18 = vand.u32 1, %v48_v13  ;;  %v50_v19 = vand.u32 1, %v46_v14  ;;  %vm290_vm5 = vcmp.eq.s32.totalorder %v49_v25, 0 }
  0x13   :  { %v106_v20 = vstv %s39_s18 }
  0x14   :  { %v61_v1 = vld.sshfl [vmem:[#allocation1 + $0x10] sm:$0xff pattern:$0x73625140]  ;;  %v59_v2 = vld.sshfl [vmem:[#allocation1] sm:$0xff pattern:$0x73625140]  ;;  %v107_v21 = vstv %s170_s19 }
  0x15   :  { %71 = vrot.lane.b32.xlu1 %v61_v1, %s244_s0  ;;  %67 = vrot.lane.b32.xlu0 %v59_v2, %s244_s0  ;;  %v62_v3 = vld.sshfl [vmem:[#allocation1 + $0x18] sm:$0xff pattern:$0x73625140]  ;;  %v60_v4 = vld.sshfl [vmem:[#allocation1 + $0x8] sm:$0xff pattern:$0x73625140]  ;;  %v113_v33 = vstv %s168_s20  ;;  %v108_v40 = vsel %vm290_vm5, %v106_v20, %v107_v21 }
  0x16   :  { %80 = vst [vmem:[#allocation1] ss:$4 sm:$0xff] %v268_v0  ;;  %vm272_vm0 = vcmp.eq.s32.totalorder %v51_v17, 0  ;;  %vm276_vm1 = vcmp.eq.s32.totalorder %v52_v18, 0  ;;  %vm280_vm2 = vcmp.eq.s32.totalorder %v50_v19, 0  ;;  %v112_v32 = vstv %s169_s21 }
  0x17   :  { %v109_v27 = vsel %vm280_vm2, %v106_v20, %v107_v21  ;;  %v110_v30 = vsel %vm272_vm0, %v106_v20, %v107_v21  ;;  %v111_v31 = vsel %vm276_vm1, %v106_v20, %v107_v21  ;;  %v115_v42 = vsel %vm280_vm2, %v112_v32, %v113_v33 }
  0x18   :  { %v122_v34 = vrot.slane %v109_v27, 6  ;;  %v123_v38 = vrot.slane %v110_v30, 4  ;;  %v124_v39 = vrot.slane %v111_v31, 2  ;;  %v114_v43 = vsel %vm290_vm5, %v112_v32, %v113_v33 }
  0x19   :  { %v116_v44 = vsel %vm272_vm0, %v112_v32, %v113_v33  ;;  %v117_v52 = vsel %vm276_vm1, %v112_v32, %v113_v33 }
  0x1a   :  { %v126_v45 = vsel %vm125_vm6, %v108_v40, %v122_v34  ;;  %v128_v46 = vsel %vm127_vm7, %v123_v38, %v124_v39 }
  0x1b   :  { %v130_v60 = vsel %vm129_vm8, %v126_v45, %v128_v46 }
  0x1d   :  { %73 = vrot.lane.b32.xlu1 %v62_v3, %s244_s0  ;;  %69 = vrot.lane.b32.xlu0 %v60_v4, %s244_s0  ;;  %v81_v5 = vld.sshfl [vmem:[#allocation1] sm:$0xff pattern:$0x73625140]  ;;  %v84_v6 = vld.sshfl [vmem:[#allocation1 + $0x18] sm:$0xff pattern:$0x73625140]  ;;  %v132_v4 = vmul.f32 %v130_v60, %v268_v0 }
  0x1e   :  { %89 = vrot.lane.b32.xlu2 %v81_v5, %s245_s1  ;;  %v83_v7 = vld.sshfl [vmem:[#allocation1 + $0x10] sm:$0xff pattern:$0x73625140]  ;;  %v82_v8 = vld.sshfl [vmem:[#allocation1 + $0x8] sm:$0xff pattern:$0x73625140] }
  0x25   :  { %95 = vrot.lane.b32.xlu1 %v84_v6, %s245_s1  ;;  %93 = vrot.lane.b32.xlu0 %v83_v7, %s245_s1 }
  0x26   :  { %91 = vrot.lane.b32.xlu2 %v82_v8, %s245_s1 }
  0x78   :  { %v90_v11 = vpop.permute.xlu2 %89 }
  0x80   :  { %v92_v26 = vpop.permute.xlu2 %91 }
  0x81   :  { %v100_v37 = vsel %vm97_vm4, %v90_v11, %v92_v26 }
  0x87   :  { %v72_v15 = vpop.permute.xlu1 %71  ;;  %v68_v16 = vpop.permute.xlu0 %67 }
  0x8f   :  { %v74_v28 = vpop.permute.xlu1 %73  ;;  %v70_v29 = vpop.permute.xlu0 %69 }
  0x90   :  { %v77_v36 = vsel %vm75_vm3, %v70_v29, %v72_v15  ;;  %v76_v47 = vsel %vm75_vm3, %v72_v15, %v74_v28  ;;  %v79_v48 = vsel %vm75_vm3, %v74_v28, %v68_v16  ;;  %v78_v49 = vsel %vm75_vm3, %v68_v16, %v70_v29 }
  0x91   :  { %v103_v41 = vsel %vm280_vm2, %v77_v36, %v100_v37 }
  0x92   :  { %v134_v53 = vmul.f32 %v115_v42, %v103_v41 }
  0x94   :  { %v141_v1 = vrot.slane %v134_v53, 6 }
  0x97   :  { %v96_v50 = vpop.permute.xlu1 %95  ;;  %v94_v51 = vpop.permute.xlu0 %93 }
  0x98   :  { %v101_v54 = vsel %vm97_vm4, %v96_v50, %v90_v11  ;;  %v98_v55 = vsel %vm97_vm4, %v94_v51, %v96_v50  ;;  %v99_v56 = vsel %vm97_vm4, %v92_v26, %v94_v51 }
  0x99   :  { %v102_v57 = vsel %vm290_vm5, %v78_v49, %v101_v54  ;;  %v104_v58 = vsel %vm272_vm0, %v76_v47, %v99_v56  ;;  %v105_v59 = vsel %vm276_vm1, %v79_v48, %v98_v55 }
  0x9a   :  { %v133_v61 = vmul.f32 %v114_v43, %v102_v57  ;;  %v135_v62 = vmul.f32 %v116_v44, %v104_v58  ;;  %v136_v63 = vmul.f32 %v117_v52, %v105_v59 }
  0x9c   :  { %v142_v2 = vrot.slane %v135_v62, 4  ;;  %v143_v3 = vrot.slane %v136_v63, 2  ;;  %v144_v5 = vsel %vm125_vm6, %v133_v61, %v141_v1 }
  0x9e   :  { %v145_v6 = vsel %vm127_vm7, %v142_v2, %v143_v3 }
  0x9f   :  { %v146_v7 = vsel %vm129_vm8, %v144_v5, %v145_v6 }
  0xa0   :  { %v148_v8 = vadd.f32 %v146_v7, %v132_v4 }
  0xa2   :  { %149 = vst [vmem:[#allocation7] sm:$0xff] %v148_v8 }
  0xa3   :  { %160 = dma.vmem_to_hbm [thread:$0]  %s156_s23, 128, %s158_s26, [#allocation4]  }
  0xa4   :  { %240 = dma.done.wait [#allocation4], 128  }
  0xa5   :  { %241 = vsyncadd [#allocation4], 4294967168 }
  0xa6   :  { %165 = vsyncpa [#allocation3], 1 }
  0xa7   :  { %166 = vsyncpa [#allocation4], 1 }
  0xa8   :  { %167 = vsyncpa [#allocation5], 1 }

</bundles_post_ra>
